<compile_context>
chip_gen: v7x
topology: tpu7x:2x2x1
jax: 0.10.0
libtpu: 0.0.40
codegen_flags: <defaults>
</compile_context>

<pallas_src>
import jax
import jax.numpy as jnp
from jax.experimental import pallas as pl
from jax.experimental.pallas import tpu as pltpu

INPUT_SIZE = 32
NUM_EXPERTS = 4
EXPERT_SIZE = 128
HIDDEN_SIZES = (64, 32)
GATE_HIDDEN = 128
BN_EPS = 1e-5


# ------------------------------------------------------------------ kernel ---
def moe_kernel(x_ref, in_st_ref, W1_ref, st1_ref, W2_ref, st2_ref,
               W3_ref, st3_ref, gW2_ref, gout_ref, out_ref):
    f32 = jnp.float32
    wdt = W1_ref.dtype                                   # f32 or bf16 MXU inputs

    x = x_ref[...]                                       # [TB, F]
    # input BatchNorm (eval) folded into scale/shift
    xn = x * in_st_ref[0:1, :] + in_st_ref[1:2, :]       # [TB, F]

    # ---- fused layer 1: [gating L1 | expert0 L1 | ... | expert3 L1] in ONE matmul
    h1 = jnp.dot(xn.astype(wdt), W1_ref[...], preferred_element_type=f32)   # [TB, 640]
    # (Linear bias folded into BN shift) -> scale/shift -> ReLU; Dropout = identity
    h1 = jnp.maximum(h1 * st1_ref[0:1, :] + st1_ref[1:2, :], 0.0)

    gh = h1[:, :GATE_HIDDEN]                             # [TB, 128] gating hidden (lane-aligned slice)
    e1 = h1[:, GATE_HIDDEN:]                             # [TB, E*128] expert L1 (concat)

    # ---- gating logits, pre-expanded: each expert's logit occupies its hs2-lane group
    logits = (jnp.dot(gh.astype(wdt), gW2_ref[...], preferred_element_type=f32)
              + gout_ref[0:1, :])                        # [TB, E*hs2]
    m = jnp.max(logits, axis=-1, keepdims=True)          # == max over the E experts
    ex = jnp.exp(logits - m)                             # exp(logit_e), replicated hs2x per expert
    denom = jnp.sum(ex, axis=-1, keepdims=True)          # == hs2 * sum_e exp(logit_e)

    # ---- expert layers 2 and 3 as block-diagonal matmuls (all experts at once)
    h2 = jnp.dot(e1.astype(wdt), W2_ref[...], preferred_element_type=f32)   # [TB, E*64]
    h2 = jnp.maximum(h2 * st2_ref[0:1, :] + st2_ref[1:2, :], 0.0)
    h3 = jnp.dot(h2.astype(wdt), W3_ref[...], preferred_element_type=f32)   # [TB, E*32]
    h3 = jnp.maximum(h3 * st3_ref[0:1, :] + st3_ref[1:2, :], 0.0)

    # ---- gate-weighted combine fused with the output Linear; softmax normalization
    #      deferred to a single [TB,1] divide:
    #      sum_e softmax_e * (h3_e @ oW) + ob
    #        == lane_sum(h3 * ex * (hs2*oW tiled)) / lane_sum(ex) + ob
    numer = jnp.sum(h3 * ex * gout_ref[1:2, :], axis=-1, keepdims=True)     # [TB, 1]
    out_ref[...] = numer / denom + gout_ref[2:3, 0:1]


# ---------------------------------------------------------------- wrapper ---
PACKED_ORDER = ("in_st", "W1", "st1", "W2", "st2", "W3", "st3", "gW2e", "gout")


def pack_params(p, num_experts=NUM_EXPERTS, mxu_dtype=jnp.float32):
    """Fold Linear biases into BN shift, concatenate / block-diagonalize weights."""
    E = num_experts
    hs2 = HIDDEN_SIZES[1]

    def fold_shift(b, s, t):            # (x@W + b)*s + t == (x@W)*s + (b*s + t)
        return b * s + t

    in_st = jnp.concatenate([p["in_s"], p["in_t"]], axis=0)                      # [2, F]

    # layer 1: gating + all experts, concatenated along output lanes
    W1 = jnp.concatenate([p["gW1"]] + [p["eW1"][e] for e in range(E)], axis=1)   # [F, 640]
    s1 = jnp.concatenate([p["gs"]] + [p["es1"][e] for e in range(E)], axis=1)
    t1 = jnp.concatenate(
        [fold_shift(p["gb1"], p["gs"], p["gt"])]
        + [fold_shift(p["eb1"][e], p["es1"][e], p["et1"][e]) for e in range(E)], axis=1)
    st1 = jnp.concatenate([s1, t1], axis=0)                                      # [2, 640]

    # layers 2 / 3: block-diagonal over experts
    W2 = jax.scipy.linalg.block_diag(*[p["eW2"][e] for e in range(E)])           # [512, 256]
    s2 = jnp.concatenate([p["es2"][e] for e in range(E)], axis=1)
    t2 = jnp.concatenate([fold_shift(p["eb2"][e], p["es2"][e], p["et2"][e])
                          for e in range(E)], axis=1)
    st2 = jnp.concatenate([s2, t2], axis=0)                                      # [2, 256]

    W3 = jax.scipy.linalg.block_diag(*[p["eW3"][e] for e in range(E)])           # [256, 128]
    s3 = jnp.concatenate([p["es3"][e] for e in range(E)], axis=1)
    t3 = jnp.concatenate([fold_shift(p["eb3"][e], p["es3"][e], p["et3"][e])
                          for e in range(E)], axis=1)
    st3 = jnp.concatenate([s3, t3], axis=0)                                      # [2, 128]

    # gating layer 2: replicate each expert's column/bias across its hs2-lane group
    gW2e = jnp.repeat(p["gW2"], hs2, axis=1)                                     # [128, E*hs2]
    gb2e = jnp.repeat(p["gb2"], hs2, axis=1)                                     # [1, E*hs2]
    # output layer weight tiled per expert group, pre-scaled by hs2 so the expanded
    # softmax denominator (which carries an extra hs2 factor) cancels exactly;
    # output bias stashed at [2, 0]
    oW_row = (jnp.tile(p["oW"][:, 0], E) * float(hs2))[None, :]                  # [1, E*hs2]
    ob_row = jnp.zeros_like(oW_row).at[0, 0].set(p["ob"][0, 0])
    gout = jnp.concatenate([gb2e, oW_row, ob_row], axis=0)                       # [3, E*hs2]

    cast = lambda w: w.astype(mxu_dtype)
    return dict(in_st=in_st, W1=cast(W1), st1=st1, W2=cast(W2), st2=st2,
                W3=cast(W3), st3=st3, gW2e=cast(gW2e), gout=gout)


def moe_forward(x, packed, *, block_b=512):
    B, F = x.shape
    # batch tile: multiple of 8 sublanes, capped at block_b (sized for v7x's 64 MiB VMEM)
    TB = max(8, min(((block_b + 7) // 8) * 8, ((B + 7) // 8) * 8))
    Bp = ((B + TB - 1) // TB) * TB
    xp = jnp.pad(x, ((0, Bp - B), (0, 0))) if Bp != B else x

    args = [xp] + [packed[k] for k in PACKED_ORDER]

    def resident_spec(a):
        nd = a.ndim
        # same block index every grid step -> weight stays resident in VMEM
        return pl.BlockSpec(a.shape, lambda *_: (0,) * nd)

    in_specs = ([pl.BlockSpec((TB, F), lambda i: (i, 0))]
                + [resident_spec(packed[k]) for k in PACKED_ORDER])
    out_spec = pl.BlockSpec((TB, 1), lambda i: (i, 0))

    out = pl.pallas_call(
        moe_kernel,
        out_shape=jax.ShapeDtypeStruct((Bp, 1), jnp.float32),
        grid=(Bp // TB,),
        in_specs=in_specs,
        out_specs=out_spec,
        compiler_params=pltpu.CompilerParams(
            dimension_semantics=("parallel",)),      # shards batch tiles across TCs on v7x
    )(*args)
    return out[:B]


# ------------------------------------------------------- parameter builder ---
def _fold_bn(gamma, beta, mean, var):
    scale = gamma / jnp.sqrt(var + BN_EPS)
    shift = beta - mean * scale
    return scale, shift


def _linear(key, fan_in, fan_out):
    kw, kb = jax.random.split(key)
    w = jax.random.normal(kw, (fan_in, fan_out), jnp.float32) * 0.05
    b = jax.random.normal(kb, (1, fan_out), jnp.float32) * 0.05
    return w, b


def _bn(key, n):
    k1, k2, k3, k4 = jax.random.split(key, 4)
    gamma = 1.0 + 0.1 * jax.random.normal(k1, (1, n), jnp.float32)
    beta = 0.1 * jax.random.normal(k2, (1, n), jnp.float32)
    mean = 0.1 * jax.random.normal(k3, (1, n), jnp.float32)
    var = jax.random.uniform(k4, (1, n), jnp.float32, 0.5, 1.5)
    return _fold_bn(gamma, beta, mean, var)


def init_params(key, input_size=INPUT_SIZE, num_experts=NUM_EXPERTS,
                expert_size=EXPERT_SIZE, hidden_sizes=HIDDEN_SIZES):
    keys = iter(jax.random.split(key, 64))
    p = {}
    # input BatchNorm
    p["in_s"], p["in_t"] = _bn(next(keys), input_size)
    # gating network
    p["gW1"], p["gb1"] = _linear(next(keys), input_size, GATE_HIDDEN)
    p["gs"], p["gt"] = _bn(next(keys), GATE_HIDDEN)
    p["gW2"], p["gb2"] = _linear(next(keys), GATE_HIDDEN, num_experts)
    # experts (stacked along leading expert axis)
    dims = [(input_size, expert_size),
            (expert_size, hidden_sizes[0]),
            (hidden_sizes[0], hidden_sizes[1])]
    for li, (din, dout) in enumerate(dims, start=1):
        Ws, bs, ss, ts = [], [], [], []
        for _ in range(num_experts):
            w, b = _linear(next(keys), din, dout)
            s, t = _bn(next(keys), dout)
            Ws.append(w); bs.append(b); ss.append(s); ts.append(t)
        p[f"eW{li}"] = jnp.stack(Ws)                      # [E, din, dout]
        p[f"eb{li}"] = jnp.stack(bs)                      # [E, 1, dout]
        p[f"es{li}"] = jnp.stack(ss)
        p[f"et{li}"] = jnp.stack(ts)
    # output layer
    p["oW"], p["ob"] = _linear(next(keys), hidden_sizes[-1], 1)
    return p


# ------------------------------------------------------ pure-JAX reference ---
def moe_reference(x, p):
    xn = x * p["in_s"] + p["in_t"]
    h = jnp.maximum((xn @ p["gW1"] + p["gb1"]) * p["gs"] + p["gt"], 0.0)
    logits = h @ p["gW2"] + p["gb2"]
    gates = jax.nn.softmax(logits, axis=1)
    outs = []
    for ei in range(p["eW1"].shape[0]):
        h1 = jnp.maximum((xn @ p["eW1"][ei] + p["eb1"][ei]) * p["es1"][ei] + p["et1"][ei], 0.0)
        h2 = jnp.maximum((h1 @ p["eW2"][ei] + p["eb2"][ei]) * p["es2"][ei] + p["et2"][ei], 0.0)
        h3 = jnp.maximum((h2 @ p["eW3"][ei] + p["eb3"][ei]) * p["es3"][ei] + p["et3"][ei], 0.0)
        outs.append(h3)
    stacked = jnp.stack(outs, axis=1)                     # [B, E, 32]
    combined = jnp.sum(stacked * gates[:, :, None], axis=1)
    return combined @ p["oW"] + p["ob"]


# ------------------------------------------------------------------- main ---
if __name__ == "__main__":
    key = jax.random.PRNGKey(0)
    kx, kp = jax.random.split(key)
    B = 8
    x = jax.random.normal(kx, (B, INPUT_SIZE), dtype=jnp.float32)
    params = init_params(kp)
    ref = moe_reference(x, params)

    # f32 MXU path (matches the original module's numerics)
    packed_f32 = pack_params(params, mxu_dtype=jnp.float32)
    out = jax.block_until_ready(moe_forward(x, packed_f32))
    assert out.shape == (B, 1), out.shape
    assert jnp.allclose(out, ref, rtol=1e-4, atol=1e-4), (out, ref)

    # bf16 MXU path (v6e / v7x: bf16-native MXU, f32 accumulation + f32 epilogue)
    packed_bf16 = pack_params(params, mxu_dtype=jnp.bfloat16)
    out_bf16 = jax.block_until_ready(moe_forward(x, packed_bf16))
    assert out_bf16.shape == (B, 1), out_bf16.shape
    assert jnp.allclose(out_bf16, ref, rtol=1e-1, atol=1e-1), (out_bf16, ref)

    print("KERNEL_OK")
</pallas_src>

<mosaic_0001>
module attributes {stable_mosaic.version = 11 : i64} {
  func.func @moe_kernel(%arg0: i32, %arg1: memref<8x32xf32, #tpu.memory_space<vmem>>, %arg2: memref<2x32xf32, #tpu.memory_space<vmem>>, %arg3: memref<32x640xf32, #tpu.memory_space<vmem>>, %arg4: memref<2x640xf32, #tpu.memory_space<vmem>>, %arg5: memref<512x256xf32, #tpu.memory_space<vmem>>, %arg6: memref<2x256xf32, #tpu.memory_space<vmem>>, %arg7: memref<256x128xf32, #tpu.memory_space<vmem>>, %arg8: memref<2x128xf32, #tpu.memory_space<vmem>>, %arg9: memref<128x128xf32, #tpu.memory_space<vmem>>, %arg10: memref<3x128xf32, #tpu.memory_space<vmem>>, %arg11: memref<8x1xf32, #tpu.memory_space<vmem>>) attributes {dimension_semantics = [#tpu.dimension_semantics<parallel>], iteration_bounds = array<i64: 1>, scalar_prefetch = 0 : i64, scratch_operands = 0 : i64, tpu.core_type = #tpu.core_type<tc>, window_params = [{transform_indices = @transform_0, window_bounds = array<i64: 8, 32>}, {pipeline_mode = #tpu.pipeline_mode<synchronous>, transform_indices = @transform_1, window_bounds = array<i64: 2, 32>}, {pipeline_mode = #tpu.pipeline_mode<synchronous>, transform_indices = @transform_2, window_bounds = array<i64: 32, 640>}, {pipeline_mode = #tpu.pipeline_mode<synchronous>, transform_indices = @transform_3, window_bounds = array<i64: 2, 640>}, {pipeline_mode = #tpu.pipeline_mode<synchronous>, transform_indices = @transform_4, window_bounds = array<i64: 512, 256>}, {pipeline_mode = #tpu.pipeline_mode<synchronous>, transform_indices = @transform_5, window_bounds = array<i64: 2, 256>}, {pipeline_mode = #tpu.pipeline_mode<synchronous>, transform_indices = @transform_6, window_bounds = array<i64: 256, 128>}, {pipeline_mode = #tpu.pipeline_mode<synchronous>, transform_indices = @transform_7, window_bounds = array<i64: 2, 128>}, {pipeline_mode = #tpu.pipeline_mode<synchronous>, transform_indices = @transform_8, window_bounds = array<i64: 128, 128>}, {pipeline_mode = #tpu.pipeline_mode<synchronous>, transform_indices = @transform_9, window_bounds = array<i64: 3, 128>}, {transform_indices = @transform_10, window_bounds = array<i64: 8, 1>}]} {
    %c0 = arith.constant 0 : index
    %c0_0 = arith.constant 0 : index
    %0 = vector.load %arg1[%c0, %c0_0] : memref<8x32xf32, #tpu.memory_space<vmem>>, vector<8x32xf32>
    %c0_1 = arith.constant 0 : index
    %c0_2 = arith.constant 0 : index
    %1 = vector.load %arg2[%c0_1, %c0_2] : memref<2x32xf32, #tpu.memory_space<vmem>>, vector<1x32xf32>
    %2 = vector.broadcast %1 : vector<1x32xf32> to vector<8x32xf32>
    %3 = arith.mulf %0, %2 : vector<8x32xf32>
    %c1 = arith.constant 1 : index
    %c0_3 = arith.constant 0 : index
    %4 = vector.load %arg2[%c1, %c0_3] : memref<2x32xf32, #tpu.memory_space<vmem>>, vector<1x32xf32>
    %5 = vector.broadcast %4 : vector<1x32xf32> to vector<8x32xf32>
    %6 = arith.addf %3, %5 : vector<8x32xf32>
    %c0_4 = arith.constant 0 : index
    %c0_5 = arith.constant 0 : index
    %7 = vector.load %arg3[%c0_4, %c0_5] : memref<32x640xf32, #tpu.memory_space<vmem>>, vector<32x640xf32>
    %cst = arith.constant dense<0.000000e+00> : vector<8x640xf32>
    %8 = tpu.matmul %6, %7, %cst {dimension_numbers = #tpu.dot_dimension_numbers<[1], [0], [0], [1], [0, 0, 1, 1], [], []>} : vector<8x32xf32>, vector<32x640xf32>, vector<8x640xf32> -> vector<8x640xf32>
    %c0_6 = arith.constant 0 : index
    %c0_7 = arith.constant 0 : index
    %9 = vector.load %arg4[%c0_6, %c0_7] : memref<2x640xf32, #tpu.memory_space<vmem>>, vector<1x640xf32>
    %10 = vector.broadcast %9 : vector<1x640xf32> to vector<8x640xf32>
    %11 = arith.mulf %8, %10 : vector<8x640xf32>
    %c1_8 = arith.constant 1 : index
    %c0_9 = arith.constant 0 : index
    %12 = vector.load %arg4[%c1_8, %c0_9] : memref<2x640xf32, #tpu.memory_space<vmem>>, vector<1x640xf32>
    %13 = vector.broadcast %12 : vector<1x640xf32> to vector<8x640xf32>
    %14 = arith.addf %11, %13 : vector<8x640xf32>
    %cst_10 = arith.constant 0.000000e+00 : f32
    %15 = vector.broadcast %cst_10 : f32 to vector<8x640xf32>
    %16 = arith.maximumf %14, %15 : vector<8x640xf32>
    %17 = vector.extract_strided_slice %16 {offsets = [0, 0], sizes = [8, 128], strides = [1, 1]} : vector<8x640xf32> to vector<8x128xf32>
    %18 = vector.extract_strided_slice %16 {offsets = [0, 128], sizes = [8, 512], strides = [1, 1]} : vector<8x640xf32> to vector<8x512xf32>
    %c0_11 = arith.constant 0 : index
    %c0_12 = arith.constant 0 : index
    %19 = vector.load %arg9[%c0_11, %c0_12] : memref<128x128xf32, #tpu.memory_space<vmem>>, vector<128x128xf32>
    %cst_13 = arith.constant dense<0.000000e+00> : vector<8x128xf32>
    %20 = tpu.matmul %17, %19, %cst_13 {dimension_numbers = #tpu.dot_dimension_numbers<[1], [0], [0], [1], [0, 0, 1, 1], [], []>} : vector<8x128xf32>, vector<128x128xf32>, vector<8x128xf32> -> vector<8x128xf32>
    %c0_14 = arith.constant 0 : index
    %c0_15 = arith.constant 0 : index
    %21 = vector.load %arg10[%c0_14, %c0_15] : memref<3x128xf32, #tpu.memory_space<vmem>>, vector<1x128xf32>
    %22 = vector.broadcast %21 : vector<1x128xf32> to vector<8x128xf32>
    %23 = arith.addf %20, %22 : vector<8x128xf32>
    %cst_16 = arith.constant dense<0xFF800000> : vector<8xf32>
    %24 = vector.multi_reduction <maximumf>, %23, %cst_16 [1] : vector<8x128xf32> to vector<8xf32>
    %25 = vector.shape_cast %24 : vector<8xf32> to vector<8x1xf32>
    %26 = vector.broadcast %25 : vector<8x1xf32> to vector<8x128xf32>
    %27 = arith.subf %23, %26 : vector<8x128xf32>
    %28 = math.exp %27 : vector<8x128xf32>
    %cst_17 = arith.constant dense<0.000000e+00> : vector<8xf32>
    %29 = vector.multi_reduction <add>, %28, %cst_17 [1] : vector<8x128xf32> to vector<8xf32>
    %30 = vector.shape_cast %29 : vector<8xf32> to vector<8x1xf32>
    %c0_18 = arith.constant 0 : index
    %c0_19 = arith.constant 0 : index
    %31 = vector.load %arg5[%c0_18, %c0_19] : memref<512x256xf32, #tpu.memory_space<vmem>>, vector<512x256xf32>
    %cst_20 = arith.constant dense<0.000000e+00> : vector<8x256xf32>
    %32 = tpu.matmul %18, %31, %cst_20 {dimension_numbers = #tpu.dot_dimension_numbers<[1], [0], [0], [1], [0, 0, 1, 1], [], []>} : vector<8x512xf32>, vector<512x256xf32>, vector<8x256xf32> -> vector<8x256xf32>
    %c0_21 = arith.constant 0 : index
    %c0_22 = arith.constant 0 : index
    %33 = vector.load %arg6[%c0_21, %c0_22] : memref<2x256xf32, #tpu.memory_space<vmem>>, vector<1x256xf32>
    %34 = vector.broadcast %33 : vector<1x256xf32> to vector<8x256xf32>
    %35 = arith.mulf %32, %34 : vector<8x256xf32>
    %c1_23 = arith.constant 1 : index
    %c0_24 = arith.constant 0 : index
    %36 = vector.load %arg6[%c1_23, %c0_24] : memref<2x256xf32, #tpu.memory_space<vmem>>, vector<1x256xf32>
    %37 = vector.broadcast %36 : vector<1x256xf32> to vector<8x256xf32>
    %38 = arith.addf %35, %37 : vector<8x256xf32>
    %cst_25 = arith.constant 0.000000e+00 : f32
    %39 = vector.broadcast %cst_25 : f32 to vector<8x256xf32>
    %40 = arith.maximumf %38, %39 : vector<8x256xf32>
    %c0_26 = arith.constant 0 : index
    %c0_27 = arith.constant 0 : index
    %41 = vector.load %arg7[%c0_26, %c0_27] : memref<256x128xf32, #tpu.memory_space<vmem>>, vector<256x128xf32>
    %cst_28 = arith.constant dense<0.000000e+00> : vector<8x128xf32>
    %42 = tpu.matmul %40, %41, %cst_28 {dimension_numbers = #tpu.dot_dimension_numbers<[1], [0], [0], [1], [0, 0, 1, 1], [], []>} : vector<8x256xf32>, vector<256x128xf32>, vector<8x128xf32> -> vector<8x128xf32>
    %c0_29 = arith.constant 0 : index
    %c0_30 = arith.constant 0 : index
    %43 = vector.load %arg8[%c0_29, %c0_30] : memref<2x128xf32, #tpu.memory_space<vmem>>, vector<1x128xf32>
    %44 = vector.broadcast %43 : vector<1x128xf32> to vector<8x128xf32>
    %45 = arith.mulf %42, %44 : vector<8x128xf32>
    %c1_31 = arith.constant 1 : index
    %c0_32 = arith.constant 0 : index
    %46 = vector.load %arg8[%c1_31, %c0_32] : memref<2x128xf32, #tpu.memory_space<vmem>>, vector<1x128xf32>
    %47 = vector.broadcast %46 : vector<1x128xf32> to vector<8x128xf32>
    %48 = arith.addf %45, %47 : vector<8x128xf32>
    %cst_33 = arith.constant 0.000000e+00 : f32
    %49 = vector.broadcast %cst_33 : f32 to vector<8x128xf32>
    %50 = arith.maximumf %48, %49 : vector<8x128xf32>
    %51 = arith.mulf %50, %28 : vector<8x128xf32>
    %c1_34 = arith.constant 1 : index
    %c0_35 = arith.constant 0 : index
    %52 = vector.load %arg10[%c1_34, %c0_35] : memref<3x128xf32, #tpu.memory_space<vmem>>, vector<1x128xf32>
    %53 = vector.broadcast %52 : vector<1x128xf32> to vector<8x128xf32>
    %54 = arith.mulf %51, %53 : vector<8x128xf32>
    %cst_36 = arith.constant dense<0.000000e+00> : vector<8xf32>
    %55 = vector.multi_reduction <add>, %54, %cst_36 [1] : vector<8x128xf32> to vector<8xf32>
    %56 = vector.shape_cast %55 : vector<8xf32> to vector<8x1xf32>
    %57 = arith.divf %56, %30 : vector<8x1xf32>
    %c2 = arith.constant 2 : index
    %c0_37 = arith.constant 0 : index
    %58 = vector.load %arg10[%c2, %c0_37] : memref<3x128xf32, #tpu.memory_space<vmem>>, vector<1x1xf32>
    %59 = vector.broadcast %58 : vector<1x1xf32> to vector<8x1xf32>
    %60 = arith.addf %57, %59 : vector<8x1xf32>
    %c0_38 = arith.constant 0 : index
    %c0_39 = arith.constant 0 : index
    %61 = vector.load %arg11[%c0_38, %c0_39] : memref<8x1xf32, #tpu.memory_space<vmem>>, vector<8x1xf32>
    tpu.vector_store %arg11[%c0_38, %c0_39], %60 {strides = array<i32>} : memref<8x1xf32, #tpu.memory_space<vmem>>, vector<8x1xf32>,
    return
  }
  func.func @transform_0(%arg0: i32) -> (i32, i32) {
    %c0_i32 = arith.constant 0 : i32
    %c0_i32_0 = arith.constant 0 : i32
    return %arg0, %c0_i32 : i32, i32
  }
  func.func @transform_1(%arg0: i32) -> (i32, i32) {
    %c0_i32 = arith.constant 0 : i32
    %c0_i32_0 = arith.constant 0 : i32
    %c0_i32_1 = arith.constant 0 : i32
    return %c0_i32, %c0_i32_0 : i32, i32
  }
  func.func @transform_2(%arg0: i32) -> (i32, i32) {
    %c0_i32 = arith.constant 0 : i32
    %c0_i32_0 = arith.constant 0 : i32
    %c0_i32_1 = arith.constant 0 : i32
    return %c0_i32, %c0_i32_0 : i32, i32
  }
  func.func @transform_3(%arg0: i32) -> (i32, i32) {
    %c0_i32 = arith.constant 0 : i32
    %c0_i32_0 = arith.constant 0 : i32
    %c0_i32_1 = arith.constant 0 : i32
    return %c0_i32, %c0_i32_0 : i32, i32
  }
  func.func @transform_4(%arg0: i32) -> (i32, i32) {
    %c0_i32 = arith.constant 0 : i32
    %c0_i32_0 = arith.constant 0 : i32
    %c0_i32_1 = arith.constant 0 : i32
    return %c0_i32, %c0_i32_0 : i32, i32
  }
  func.func @transform_5(%arg0: i32) -> (i32, i32) {
    %c0_i32 = arith.constant 0 : i32
    %c0_i32_0 = arith.constant 0 : i32
    %c0_i32_1 = arith.constant 0 : i32
    return %c0_i32, %c0_i32_0 : i32, i32
  }
  func.func @transform_6(%arg0: i32) -> (i32, i32) {
    %c0_i32 = arith.constant 0 : i32
    %c0_i32_0 = arith.constant 0 : i32
    %c0_i32_1 = arith.constant 0 : i32
    return %c0_i32, %c0_i32_0 : i32, i32
  }
  func.func @transform_7(%arg0: i32) -> (i32, i32) {
    %c0_i32 = arith.constant 0 : i32
    %c0_i32_0 = arith.constant 0 : i32
    %c0_i32_1 = arith.constant 0 : i32
    return %c0_i32, %c0_i32_0 : i32, i32
  }
  func.func @transform_8(%arg0: i32) -> (i32, i32) {
    %c0_i32 = arith.constant 0 : i32
    %c0_i32_0 = arith.constant 0 : i32
    %c0_i32_1 = arith.constant 0 : i32
    return %c0_i32, %c0_i32_0 : i32, i32
  }
  func.func @transform_9(%arg0: i32) -> (i32, i32) {
    %c0_i32 = arith.constant 0 : i32
    %c0_i32_0 = arith.constant 0 : i32
    %c0_i32_1 = arith.constant 0 : i32
    return %c0_i32, %c0_i32_0 : i32, i32
  }
  func.func @transform_10(%arg0: i32) -> (i32, i32) {
    %c0_i32 = arith.constant 0 : i32
    %c0_i32_0 = arith.constant 0 : i32
    return %arg0, %c0_i32 : i32, i32
  }
}

</mosaic_0001>

<bundles_post_ra>
// kernel: tpu_custom_call.1
= control target key start
LH: loop header
LB: loop body
LE: loop exit
PB: predicated region body
PF: predicated region fallthrough
CT: control target
= control target key end

     0   :  { %15 = vsyncpa [#allocation3], 0  ;;  %s1701_s0 = inlined_call_operand.hbm [shape: f32[8,32], index: 0, kind: input, shape index: {}]   ;;  %s1702_s1 = inlined_call_operand.hbm [shape: f32[2,32], index: 1, kind: input, shape index: {}]   ;;  %s1703_s2 = inlined_call_operand.hbm [shape: f32[32,640], index: 2, kind: input, shape index: {}]   ;;  %s1704_s3 = inlined_call_operand.vmem [shape: f32[2,640], index: 3, kind: input, shape index: {}]   ;;  %s1705_s4 = inlined_call_operand.hbm [shape: f32[512,256], index: 4, kind: input, shape index: {}]   ;;  %s1706_s5 = inlined_call_operand.vmem [shape: f32[2,256], index: 5, kind: input, shape index: {}]   ;;  %s1707_s6 = inlined_call_operand.hbm [shape: f32[256,128], index: 6, kind: input, shape index: {}]   ;;  %s1708_s7 = inlined_call_operand.vmem [shape: f32[2,128], index: 7, kind: input, shape index: {}]   ;;  %s1709_s8 = inlined_call_operand.hbm [shape: f32[128,128], index: 8, kind: input, shape index: {}]   ;;  %s1710_s9 = inlined_call_operand.vmem [shape: f32[3,128], index: 9, kind: input, shape index: {}]   ;;  %s1711_s10 = inlined_call_operand.vmem [shape: f32[8,1], index: 10, kind: output, shape index: {}]  }
   0x1   :  { %16 = vsyncpa [#allocation5], 0 }
   0x2   :  { %17 = vsyncpa [#allocation8], 0 }
   0x3   :  { %18 = vsyncpa [#allocation11], 0  ;;  %s1455_s13 = smov [#allocation4]   ;;  %s1456_s15 = smov [#allocation7]  }
   0x4   :  { %s35_s14 = sshll.u32 %s1455_s13, 4  ;;  %s58_s16 = sshll.u32 %s1456_s15, 4  ;;  %s36_s14 = int_to_ptr.vmem [resolvable:$true] %s35_s14  ;;  %s1525_s16 = int_to_ptr.vmem [resolvable:$true] %s58_s16 }
   0x5   :  { %s1315_s19 = scalar_lea.hbm %s1702_s1, 32 }
   0x6   :  { %p1316_p0 = scmp.ne.s32.totalorder %s1702_s1, %s1315_s19  ;;  %p1319_p1 = scmp.lt.u32.totalorder %s1315_s19, %s1702_s1 }
   0x8   :  { %p1321_p2 = pnand %p1319_p1, %p1316_p0 }
   0xa   :  { %1324 = shalt.err (!%p1321_p2)
}
   0xb   :  { %s1325_s24 = scalar_lea.vmem %s36_s14, 32  ;;  %p1330_p4 = scmp.lt.s32.totalorder %s36_s14, %s36_s14 }
   0xc   :  { %p1326_p3 = scmp.ne.s32.totalorder %s36_s14, %s1325_s24  ;;  %p1331_p5 = scmp.lt.s32.totalorder %s1325_s24, %s1325_s24 }
   0xe   :  { %p1332_p6 = por %p1331_p5, %p1330_p4 }
  0x10   :  { %p1333_p7 = pnand %p1332_p6, %p1326_p3 }
  0x12   :  { %1336 = shalt.err (!%p1333_p7)
}
  0x13   :  { %38 = dma.hbm_to_vmem [thread:$0]  %s1702_s1, 32, %s36_s14, [#allocation5]  }
  0x14   :  { %s1337_s29 = scalar_lea.hbm %s1705_s4, 16384 }
  0x15   :  { %p1338_p8 = scmp.ne.s32.totalorder %s1705_s4, %s1337_s29  ;;  %p1341_p9 = scmp.lt.u32.totalorder %s1337_s29, %s1705_s4 }
  0x17   :  { %p1343_p10 = pnand %p1341_p9, %p1338_p8 }
  0x19   :  { %1346 = shalt.err (!%p1343_p10)
}
  0x1a   :  { %s1347_s15 = scalar_lea.vmem %s1525_s16, 16384  ;;  %p1352_p12 = scmp.lt.s32.totalorder %s1525_s16, %s1525_s16 }
  0x1b   :  { %p1348_p11 = scmp.ne.s32.totalorder %s1525_s16, %s1347_s15  ;;  %p1353_p13 = scmp.lt.s32.totalorder %s1347_s15, %s1347_s15 }
  0x1d   :  { %p1354_p0 = por %p1353_p13, %p1352_p12 }
  0x1f   :  { %p1355_p1 = pnand %p1354_p0, %p1348_p11 }
  0x21   :  { %1358 = shalt.err (!%p1355_p1)
}
  0x22   :  { %s1457_s1 = smov 256   ;;  %s1458_s14 = smov 16  }
  0x23   :  { %64 = dma.hbm_to_vmem [thread:$0]  %s1705_s4, 16384, %s1525_s16, [#allocation8], %s1457_s1, %s1457_s1, %s1458_s14  }
  0x24   :  { %s1459_s19 = smov [#allocation2]   ;;  %s1460_s21 = smov [#allocation6]  }
  0x25   :  { %s25_s20 = sshll.u32 %s1459_s19, 4  ;;  %s44_s22 = sshll.u32 %s1460_s21, 4  ;;  %s26_s20 = int_to_ptr.vmem [resolvable:$true] %s25_s20  ;;  %s1556_s22 = int_to_ptr.vmem [resolvable:$true] %s44_s22 }
  0x26   :  { %s1359_s25 = scalar_lea.hbm %s1701_s0, 128 }
  0x27   :  { %p1360_p2 = scmp.ne.s32.totalorder %s1701_s0, %s1359_s25  ;;  %p1363_p3 = scmp.lt.u32.totalorder %s1359_s25, %s1701_s0 }
  0x29   :  { %p1365_p4 = pnand %p1363_p3, %p1360_p2 }
  0x2b   :  { %1368 = shalt.err (!%p1365_p4)
}
  0x2c   :  { %s1369_s4 = scalar_lea.vmem %s26_s20, 128  ;;  %p1374_p6 = scmp.lt.s32.totalorder %s26_s20, %s26_s20 }
  0x2d   :  { %p1370_p5 = scmp.ne.s32.totalorder %s26_s20, %s1369_s4  ;;  %p1375_p7 = scmp.lt.s32.totalorder %s1369_s4, %s1369_s4 }
  0x2f   :  { %p1376_p8 = por %p1375_p7, %p1374_p6 }
  0x31   :  { %p1377_p9 = pnand %p1376_p8, %p1370_p5 }
  0x33   :  { %1380 = shalt.err (!%p1377_p9)
}
  0x34   :  { %28 = dma.hbm_to_vmem [thread:$0]  %s1701_s0, 128, %s26_s20, [#allocation3]  }
  0x35   :  { %s1381_s13 = scalar_lea.hbm %s1703_s2, 2560 }
  0x36   :  { %p1382_p10 = scmp.ne.s32.totalorder %s1703_s2, %s1381_s13  ;;  %p1385_p11 = scmp.lt.u32.totalorder %s1381_s13, %s1703_s2 }
  0x38   :  { %p1387_p12 = pnand %p1385_p11, %p1382_p10 }
  0x3a   :  { %1390 = shalt.err (!%p1387_p12)
}
  0x3b   :  { %s1391_s18 = scalar_lea.vmem %s1556_s22, 2560  ;;  %p1396_p0 = scmp.lt.s32.totalorder %s1556_s22, %s1556_s22 }
  0x3c   :  { %p1392_p13 = scmp.ne.s32.totalorder %s1556_s22, %s1391_s18  ;;  %p1397_p1 = scmp.lt.s32.totalorder %s1391_s18, %s1391_s18 }
  0x3e   :  { %p1398_p2 = por %p1397_p1, %p1396_p0 }
  0x40   :  { %p1399_p3 = pnand %p1398_p2, %p1392_p13 }
  0x42   :  { %1402 = shalt.err (!%p1399_p3)
}
  0x43   :  { %s1461_s0 = smov 640   ;;  %s1462_s19 = smov 40  }
  0x44   :  { %50 = dma.hbm_to_vmem [thread:$0]  %s1703_s2, 2560, %s1556_s22, [#allocation5], %s1461_s0, %s1461_s0, %s1462_s19  }
  0x45   :  { %s1463_s23 = smov [#allocation9]   ;;  %s1403_s27 = scalar_lea.hbm %s1707_s6, 4096 }
  0x46   :  { %s72_s24 = sshll.u32 %s1463_s23, 4  ;;  %p1404_p4 = scmp.ne.s32.totalorder %s1707_s6, %s1403_s27  ;;  %s73_s24 = int_to_ptr.vmem [resolvable:$true] %s72_s24 }
  0x47   :  { %p1407_p5 = scmp.lt.u32.totalorder %s1403_s27, %s1707_s6 }
  0x49   :  { %p1409_p6 = pnand %p1407_p5, %p1404_p4 }
  0x4b   :  { %1412 = shalt.err (!%p1409_p6)
}
  0x4c   :  { %s1413_s30 = scalar_lea.vmem %s73_s24, 4096  ;;  %p1418_p8 = scmp.lt.s32.totalorder %s73_s24, %s73_s24 }
  0x4d   :  { %p1414_p7 = scmp.ne.s32.totalorder %s73_s24, %s1413_s30  ;;  %p1419_p9 = scmp.lt.s32.totalorder %s1413_s30, %s1413_s30 }
  0x4f   :  { %p1420_p10 = por %p1419_p9, %p1418_p8 }
  0x51   :  { %p1421_p11 = pnand %p1420_p10, %p1414_p7 }
  0x53   :  { %1424 = shalt.err (!%p1421_p11)
}
  0x54   :  { %s1464_s2 = smov 128   ;;  %s1465_s22 = smov 8  }
  0x55   :  { %78 = dma.hbm_to_vmem [thread:$0]  %s1707_s6, 4096, %s73_s24, [#allocation8], %s1464_s2, %s1464_s2, %s1465_s22  }
  0x56   :  { %s1466_s13 = smov [#allocation10]   ;;  %s1425_s17 = scalar_lea.hbm %s1709_s8, 2048 }
  0x57   :  { %s86_s15 = sshll.u32 %s1466_s13, 4  ;;  %p1426_p12 = scmp.ne.s32.totalorder %s1709_s8, %s1425_s17  ;;  %s87_s15 = int_to_ptr.vmem [resolvable:$true] %s86_s15 }
  0x58   :  { %p1429_p13 = scmp.lt.u32.totalorder %s1425_s17, %s1709_s8 }
  0x5a   :  { %p1431_p0 = pnand %p1429_p13, %p1426_p12 }
  0x5c   :  { %1434 = shalt.err (!%p1431_p0)
}
  0x5d   :  { %s1435_s21 = scalar_lea.vmem %s87_s15, 2048  ;;  %p1440_p2 = scmp.lt.s32.totalorder %s87_s15, %s87_s15 }
  0x5e   :  { %p1436_p1 = scmp.ne.s32.totalorder %s87_s15, %s1435_s21  ;;  %p1441_p3 = scmp.lt.s32.totalorder %s1435_s21, %s1435_s21 }
  0x60   :  { %p1442_p4 = por %p1441_p3, %p1440_p2 }
  0x62   :  { %p1443_p5 = pnand %p1442_p4, %p1436_p1 }
  0x64   :  { %1446 = shalt.err (!%p1443_p5)
}
  0x65   :  { %92 = dma.hbm_to_vmem [thread:$0]  %s1709_s8, 2048, %s87_s15, [#allocation11], %s1464_s2, %s1464_s2, %s1465_s22  }
  0x66   :  { %1447 = dma.done.wait [#allocation3], 128  }
  0x67   :  { %1448 = vsyncadd [#allocation3], 4294967168 }
  0x68   :  { %1449 = dma.done.wait [#allocation5], 2592  }
  0x69   :  { %1450 = vsyncadd [#allocation5], 4294964704 }
  0x6a   :  { %1451 = dma.done.wait [#allocation8], 20480  }
  0x6b   :  { %1452 = vsyncadd [#allocation8], 4294946816 }
  0x6c   :  { %1453 = dma.done.wait [#allocation11], 2048  }
  0x6d   :  { %1454 = vsyncadd [#allocation11], 4294965248  ;;  %v1467_v0 = vmov 0.0   ;;  %v127_v1 = vld [vmem:[#allocation6 + $0x8] sm:$0xff]  ;;  %v132_v2 = vld [vmem:[#allocation6 + $0x30] sm:$0xff]  ;;  %vm146_vm0 = vcmask 261120  }
  0x6e   :  { %214 = vmatprep.mubr.f32.mxu1 %v1467_v0  ;;  %v126_v3 = vld [vmem:[#allocation6] sm:$0xff]  ;;  %v1088_v4 = vpack.c.bf16 %v132_v2, %v127_v1  ;;  %v131_v5 = vld [vmem:[#allocation6 + $0x28] sm:$0xff]  ;;  %v137_v6 = vld [vmem:[#allocation6 + $0x58] sm:$0xff]  ;;  %v1468_v52 = vmov 0.0|0.0   ;;  %vm1469_vm1 = vmmov 0   ;;  %vm963_vm2 = vcmask 7168  }
  0x6f   :  { %v142_v7 = vld [vmem:[#allocation6 + $0x80] sm:$0xff]  ;;  %v1090_v8 = vpack.c.bf16 %v131_v5, %v126_v3  ;;  %v136_v10 = vld [vmem:[#allocation6 + $0x50] sm:$0xff]  ;;  %v141_v11 = vld [vmem:[#allocation6 + $0x78] sm:$0xff] }
  0x70   :  { %v1092_v9 = vpack.c.bf16 %v142_v7, %v137_v6  ;;  %v113_v12 = vld [vmem:[#allocation2] sm:$0xff]  ;;  %1089 = vmatprep.subr.bf16.mxu1 %v1088_v4  ;;  %v973_v13 = vld [vmem:[#allocation4] ss:$0 sm:$0xff]  ;;  %v1094_v15 = vpack.c.bf16 %v141_v11, %v136_v10  ;;  %v974_v17 = vld [vmem:[#allocation4 + $0x1] ss:$0 sm:$0xff] }
  0x71   :  { %v129_v14 = vld [vmem:[#allocation6 + $0x18] sm:$0xff]  ;;  %1091 = vmatpush1.bf16.msra.mxu1 %v1090_v8  ;;  %v119_v16 = vmul.f32 %v973_v13, %v113_v12  ;;  %v134_v18 = vld [vmem:[#allocation6 + $0x40] sm:$0xff]  ;;  %v128_v20 = vld [vmem:[#allocation6 + $0x10] sm:$0xff] }
  0x72   :  { %1093 = vmatprep.subr.bf16.mxu1 %v1092_v9  ;;  %v1096_v19 = vpack.c.bf16 %v134_v18, %v129_v14  ;;  %v133_v21 = vld [vmem:[#allocation6 + $0x38] sm:$0xff]  ;;  %v139_v22 = vld [vmem:[#allocation6 + $0x68] sm:$0xff]  ;;  %v144_v23 = vld [vmem:[#allocation6 + $0x90] sm:$0xff] }
  0x73   :  { %v1612_v24 = vadd.f32 %v974_v17, %v119_v16  ;;  %v138_v25 = vld [vmem:[#allocation6 + $0x60] sm:$0xff]  ;;  %v531_v26 = vld [vmem:[#allocation7 + $0x8] sm:$0xff]  ;;  %v1098_v27 = vpack.c.bf16 %v133_v21, %v128_v20  ;;  %v533_v28 = vld [vmem:[#allocation7 + $0x18] sm:$0xff]  ;;  %v1100_v31 = vpack.c.bf16 %v144_v23, %v139_v22 }
  0x74   :  { %v530_v29 = vld [vmem:[#allocation7] sm:$0xff]  ;;  %v532_v30 = vld [vmem:[#allocation7 + $0x10] sm:$0xff]  ;;  %v143_v32 = vld [vmem:[#allocation6 + $0x88] sm:$0xff]  ;;  %v1134_v33 = vpack.c.bf16 %v533_v28, %v531_v26 }
  0x75   :  { %1095 = vmatpush1.bf16.msra.mxu1 %v1094_v15  ;;  %v1136_v34 = vpack.c.bf16 %v532_v30, %v530_v29  ;;  %v535_v35 = vld [vmem:[#allocation7 + $0x28] sm:$0xff]  ;;  %v537_v36 = vld [vmem:[#allocation7 + $0x38] sm:$0xff]  ;;  %v534_v38 = vld [vmem:[#allocation7 + $0x20] sm:$0xff]  ;;  %v1102_v42 = vpack.c.bf16 %v143_v32, %v138_v25 }
  0x76   :  { %1097 = vmatprep.subr.bf16.mxu1 %v1096_v19  ;;  %v1138_v37 = vpack.c.bf16 %v537_v36, %v535_v35  ;;  %v536_v39 = vld [vmem:[#allocation7 + $0x30] sm:$0xff]  ;;  %1135 = vmatprep.subr.bf16.mxu0 %v1134_v33  ;;  %v539_v40 = vld [vmem:[#allocation7 + $0x48] sm:$0xff]  ;;  %v541_v41 = vld [vmem:[#allocation7 + $0x58] sm:$0xff] }
  0x77   :  { %v130_v43 = vld [vmem:[#allocation6 + $0x20] sm:$0xff]  ;;  %v135_v44 = vld [vmem:[#allocation6 + $0x48] sm:$0xff]  ;;  %1137 = vmatpush1.bf16.msra.mxu0 %v1136_v34  ;;  %v1140_v45 = vpack.c.bf16 %v536_v39, %v534_v38  ;;  %v1142_v46 = vpack.c.bf16 %v541_v41, %v539_v40  ;;  %v540_v48 = vld [vmem:[#allocation7 + $0x50] sm:$0xff] }
  0x78   :  { %975 = vmatmul.mubr.msk.f32.vlgmr.msra.gmra.mrb[0].mxu1 %vm146_vm0, %v1612_v24  ;;  %1139 = vmatprep.subr.bf16.mxu0 %v1138_v37  ;;  %v538_v47 = vld [vmem:[#allocation7 + $0x40] sm:$0xff]  ;;  %v543_v49 = vld [vmem:[#allocation7 + $0x68] sm:$0xff]  ;;  %v545_v50 = vld [vmem:[#allocation7 + $0x78] sm:$0xff]  ;;  %v1105_v51 = vpack.c.bf16 %v135_v44, %v130_v43 }
  0x79   :  { %1099 = vmatpush1.bf16.msra.mxu1 %v1098_v27  ;;  %285 = vmatprep.mubr.f32.mxu1 %v1467_v0  ;;  %v140_v53 = vld [vmem:[#allocation6 + $0x70] sm:$0xff]  ;;  %v145_v54 = vld [vmem:[#allocation6 + $0x98] sm:$0xff]  ;;  %v1144_v55 = vpack.c.bf16 %v540_v48, %v538_v47  ;;  %v1146_v56 = vpack.c.bf16 %v545_v50, %v543_v49  ;;  %v542_v57 = vld [vmem:[#allocation7 + $0x60] sm:$0xff] }
  0x7a   :  { %1101 = vmatprep.subr.bf16.mxu1 %v1100_v31  ;;  %v544_v58 = vld [vmem:[#allocation7 + $0x70] sm:$0xff]  ;;  %v547_v59 = vld [vmem:[#allocation7 + $0x88] sm:$0xff]  ;;  %v549_v60 = vld [vmem:[#allocation7 + $0x98] sm:$0xff]  ;;  %v1108_v61 = vpack.c.bf16 %v145_v54, %v140_v53 }
  0x7b   :  { %1141 = vmatpush1.bf16.msra.mxu0 %v1140_v45  ;;  %v1148_v62 = vpack.c.bf16 %v544_v58, %v542_v57  ;;  %v432_v63 = vld [vmem:[#allocation10] sm:$0xff]  ;;  %v433_v1 = vld [vmem:[#allocation10 + $0x8] sm:$0xff]  ;;  %v1150_v2 = vpack.c.bf16 %v549_v60, %v547_v59  ;;  %v548_v4 = vld [vmem:[#allocation7 + $0x90] sm:$0xff] }
  0x7c   :  { %1143 = vmatprep.subr.bf16.mxu0 %v1142_v46  ;;  %v546_v3 = vld [vmem:[#allocation7 + $0x80] sm:$0xff]  ;;  %v551_v5 = vld [vmem:[#allocation7 + $0xa8] sm:$0xff]  ;;  %v553_v6 = vld [vmem:[#allocation7 + $0xb8] sm:$0xff]  ;;  %v1111_v7 = vpack.c.bf16 %v433_v1, %v432_v63 }
  0x7d   :  { %1103 = vmatpush1.bf16.msra.mxu1 %v1102_v42  ;;  %v1152_v8 = vpack.c.bf16 %v548_v4, %v546_v3  ;;  %v434_v9 = vld [vmem:[#allocation10 + $0x10] sm:$0xff]  ;;  %v435_v10 = vld [vmem:[#allocation10 + $0x18] sm:$0xff]  ;;  %v1154_v11 = vpack.c.bf16 %v553_v6, %v551_v5  ;;  %v550_v12 = vld [vmem:[#allocation7 + $0xa0] sm:$0xff] }
  0x7e   :  { %1104 = vmatprep.subr.bf16.mxu1 %v1468_v52  ;;  %v552_v13 = vld [vmem:[#allocation7 + $0xb0] sm:$0xff]  ;;  %v555_v14 = vld [vmem:[#allocation7 + $0xc8] sm:$0xff]  ;;  %v557_v15 = vld [vmem:[#allocation7 + $0xd8] sm:$0xff]  ;;  %v1114_v16 = vpack.c.bf16 %v435_v10, %v434_v9 }
  0x7f   :  { %1145 = vmatpush1.bf16.msra.mxu0 %v1144_v55  ;;  %v1156_v17 = vpack.c.bf16 %v552_v13, %v550_v12  ;;  %v436_v18 = vld [vmem:[#allocation10 + $0x20] sm:$0xff]  ;;  %v437_v19 = vld [vmem:[#allocation10 + $0x28] sm:$0xff]  ;;  %v1158_v20 = vpack.c.bf16 %v557_v15, %v555_v14  ;;  %v556_v22 = vld [vmem:[#allocation7 + $0xd0] sm:$0xff] }
  0x80   :  { %976 = vmatmul.mubr.msk.f32.vlgmr.msra.gmra.mrb[2].mxu1 %vm146_vm0, %v1612_v24  ;;  %1147 = vmatprep.subr.bf16.mxu0 %v1146_v56  ;;  %v554_v21 = vld [vmem:[#allocation7 + $0xc0] sm:$0xff]  ;;  %v559_v23 = vld [vmem:[#allocation7 + $0xe8] sm:$0xff]  ;;  %v561_v25 = vld [vmem:[#allocation7 + $0xf8] sm:$0xff] }
  0x81   :  { %1106 = vmatpush3.bf16.msra.mxu1 %v1105_v51  ;;  %1050 = vmatprep.mubr.msk.f32.mxu1 %vm1469_vm1, %v1467_v0  ;;  %v1160_v26 = vpack.c.bf16 %v556_v22, %v554_v21  ;;  %v438_v27 = vld [vmem:[#allocation10 + $0x30] sm:$0xff]  ;;  %v1162_v28 = vpack.c.bf16 %v561_v25, %v559_v23  ;;  %v558_v29 = vld [vmem:[#allocation7 + $0xe0] sm:$0xff]  ;;  %v563_v31 = vld [vmem:[#allocation7 + $0x108] sm:$0xff] }
  0x82   :  { %1107 = vmatprep.subr.bf16.mxu1 %v1468_v52  ;;  %v560_v30 = vld [vmem:[#allocation7 + $0xf0] sm:$0xff]  ;;  %v565_v32 = vld [vmem:[#allocation7 + $0x118] sm:$0xff]  ;;  %v440_v35 = vld [vmem:[#allocation10 + $0x40] sm:$0xff] }
  0x83   :  { %1149 = vmatpush1.bf16.msra.mxu0 %v1148_v62  ;;  %v1164_v34 = vpack.c.bf16 %v560_v30, %v558_v29  ;;  %v441_v36 = vld [vmem:[#allocation10 + $0x48] sm:$0xff]  ;;  %v1166_v37 = vpack.c.bf16 %v565_v32, %v563_v31  ;;  %v562_v38 = vld [vmem:[#allocation7 + $0x100] sm:$0xff]  ;;  %v564_v39 = vld [vmem:[#allocation7 + $0x110] sm:$0xff]  ;;  %v364_v32 = vlaneseq }
  0x84   :  { %1151 = vmatprep.subr.bf16.mxu0 %v1150_v2  ;;  %v567_v40 = vld [vmem:[#allocation7 + $0x128] sm:$0xff]  ;;  %v569_v41 = vld [vmem:[#allocation7 + $0x138] sm:$0xff]  ;;  %v1123_v42 = vpack.c.bf16 %v441_v36, %v440_v35  ;;  %v1168_v43 = vpack.c.bf16 %v564_v39, %v562_v38  ;;  %v442_v44 = vld [vmem:[#allocation10 + $0x50] sm:$0xff] }
  0x85   :  { %1109 = vmatpush3.bf16.msra.mxu1 %v1108_v61  ;;  %v443_v45 = vld [vmem:[#allocation10 + $0x58] sm:$0xff]  ;;  %v1170_v46 = vpack.c.bf16 %v569_v41, %v567_v40  ;;  %v566_v47 = vld [vmem:[#allocation7 + $0x120] sm:$0xff]  ;;  %v568_v48 = vld [vmem:[#allocation7 + $0x130] sm:$0xff] }
  0x86   :  { %1110 = vmatprep.subr.bf16.mxu1 %v1468_v52  ;;  %v571_v49 = vld [vmem:[#allocation7 + $0x148] sm:$0xff]  ;;  %v573_v50 = vld [vmem:[#allocation7 + $0x158] sm:$0xff]  ;;  %v1126_v51 = vpack.c.bf16 %v443_v45, %v442_v44  ;;  %v1172_v53 = vpack.c.bf16 %v568_v48, %v566_v47  ;;  %v570_v55 = vld [vmem:[#allocation7 + $0x140] sm:$0xff] }
  0x87   :  { %1153 = vmatpush1.bf16.msra.mxu0 %v1152_v8  ;;  %v1174_v54 = vpack.c.bf16 %v573_v50, %v571_v49  ;;  %v572_v56 = vld [vmem:[#allocation7 + $0x150] sm:$0xff]  ;;  %v575_v57 = vld [vmem:[#allocation7 + $0x168] sm:$0xff]  ;;  %v577_v58 = vld [vmem:[#allocation7 + $0x178] sm:$0xff] }
  0x88   :  { %1051 = vmatmul.mubr.msk.f32.vlgmr.msra.gmra.mrb[4].mxu1 %vm146_vm0, %v1612_v24  ;;  %1155 = vmatprep.subr.bf16.mxu0 %v1154_v11  ;;  %v1117_v24 = vpack.c.bf16 %v437_v19, %v436_v18  ;;  %v1176_v59 = vpack.c.bf16 %v572_v56, %v570_v55  ;;  %v1178_v60 = vpack.c.bf16 %v577_v58, %v575_v57  ;;  %v574_v61 = vld [vmem:[#allocation7 + $0x160] sm:$0xff]  ;;  %v576_v62 = vld [vmem:[#allocation7 + $0x170] sm:$0xff]  ;;  %v579_v63 = vld [vmem:[#allocation7 + $0x188] sm:$0xff] }
  0x89   :  { %1112 = vmatpush3.bf16.msra.mxu1 %v1111_v7  ;;  %1085 = vmatprep.mubr.msk.f32.mxu1 %vm1469_vm1, %v1467_v0  ;;  %v439_v0 = vld [vmem:[#allocation10 + $0x38] sm:$0xff]  ;;  %v1180_v2 = vpack.c.bf16 %v576_v62, %v574_v61  ;;  %v444_v4 = vld [vmem:[#allocation10 + $0x60] sm:$0xff]  ;;  %v445_v5 = vld [vmem:[#allocation10 + $0x68] sm:$0xff] }
  0x8a   :  { %1113 = vmatprep.subr.bf16.mxu1 %v1468_v52  ;;  %v1120_v33 = vpack.c.bf16 %v439_v0, %v438_v27  ;;  %v581_v1 = vld [vmem:[#allocation7 + $0x198] sm:$0xff]  ;;  %v578_v6 = vld [vmem:[#allocation7 + $0x180] sm:$0xff]  ;;  %v1129_v7 = vpack.c.bf16 %v445_v5, %v444_v4  ;;  %v580_v8 = vld [vmem:[#allocation7 + $0x190] sm:$0xff] }
  0x8b   :  { %1157 = vmatpush1.bf16.msra.mxu0 %v1156_v17  ;;  %v1182_v3 = vpack.c.bf16 %v581_v1, %v579_v63  ;;  %v1184_v9 = vpack.c.bf16 %v580_v8, %v578_v6  ;;  %v583_v10 = vld [vmem:[#allocation7 + $0x1a8] sm:$0xff]  ;;  %v585_v11 = vld [vmem:[#allocation7 + $0x1b8] sm:$0xff]  ;;  %v446_v13 = vld [vmem:[#allocation10 + $0x70] sm:$0xff] }
  0x8c   :  { %1159 = vmatprep.subr.bf16.mxu0 %v1158_v20  ;;  %v1186_v12 = vpack.c.bf16 %v585_v11, %v583_v10  ;;  %v447_v14 = vld [vmem:[#allocation10 + $0x78] sm:$0xff]  ;;  %v582_v15 = vld [vmem:[#allocation7 + $0x1a0] sm:$0xff]  ;;  %v584_v17 = vld [vmem:[#allocation7 + $0x1b0] sm:$0xff] }
  0x8d   :  { %1115 = vmatpush3.bf16.msra.mxu1 %v1114_v16  ;;  %v1132_v16 = vpack.c.bf16 %v447_v14, %v446_v13  ;;  %v1188_v18 = vpack.c.bf16 %v584_v17, %v582_v15  ;;  %v587_v19 = vld [vmem:[#allocation7 + $0x1c8] sm:$0xff]  ;;  %v589_v20 = vld [vmem:[#allocation7 + $0x1d8] sm:$0xff]  ;;  %v586_v22 = vld [vmem:[#allocation7 + $0x1c0] sm:$0xff] }
  0x8e   :  { %1116 = vmatprep.subr.bf16.mxu1 %v1468_v52  ;;  %v1190_v21 = vpack.c.bf16 %v589_v20, %v587_v19  ;;  %v588_v23 = vld [vmem:[#allocation7 + $0x1d0] sm:$0xff]  ;;  %v590_v27 = vld [vmem:[#allocation7 + $0x1e0] sm:$0xff]  ;;  %v595_v29 = vld [vmem:[#allocation7 + $0x208] sm:$0xff] }
  0x8f   :  { %1161 = vmatpush1.bf16.msra.mxu0 %v1160_v26  ;;  %v1192_v25 = vpack.c.bf16 %v588_v23, %v586_v22  ;;  %v593_v26 = vld [vmem:[#allocation7 + $0x1f8] sm:$0xff]  ;;  %v592_v0 = vld [vmem:[#allocation7 + $0x1f0] sm:$0xff]  ;;  %v594_v57 = vld [vmem:[#allocation7 + $0x200] sm:$0xff] }
  0x90   :  { %1163 = vmatprep.subr.bf16.mxu0 %v1162_v28  ;;  %v1196_v28 = vpack.c.bf16 %v592_v0, %v590_v27  ;;  %v597_v30 = vld [vmem:[#allocation7 + $0x218] sm:$0xff]  ;;  %v596_v58 = vld [vmem:[#allocation7 + $0x210] sm:$0xff]  ;;  %v598_v4 = vld [vmem:[#allocation7 + $0x220] sm:$0xff] }
  0x91   :  { %1118 = vmatpush3.bf16.msra.mxu1 %v1117_v24  ;;  %v591_v24 = vld [vmem:[#allocation7 + $0x1e8] sm:$0xff]  ;;  %v1198_v31 = vpack.c.bf16 %v597_v30, %v595_v29  ;;  %v1643_v35 = vld [vmem:[%s1704_s3] ss:$2 sm:$0x1f]  ;;  %v1200_v63 = vpack.c.bf16 %v596_v58, %v594_v57  ;;  %v600_v5 = vld [vmem:[#allocation7 + $0x230] sm:$0xff] }
  0x92   :  { %1119 = vmatprep.subr.bf16.mxu1 %v1468_v52  ;;  %v1648_v36 = vld [vmem:[%s1704_s3 + $0x1] ss:$2 sm:$0x1f]  ;;  %v603_v6 = vld [vmem:[#allocation7 + $0x248] sm:$0xff]  ;;  %v1204_v10 = vpack.c.bf16 %v600_v5, %v598_v4  ;;  %v604_v15 = vld [vmem:[#allocation7 + $0x250] sm:$0xff] }
  0x93   :  { %1165 = vmatpush1.bf16.msra.mxu0 %v1164_v34  ;;  %v601_v61 = vld [vmem:[#allocation7 + $0x238] sm:$0xff]  ;;  %v602_v14 = vld [vmem:[#allocation7 + $0x240] sm:$0xff]  ;;  %v608_v23 = vld [vmem:[#allocation7 + $0x270] sm:$0xff] }
  0x94   :  { %1167 = vmatprep.subr.bf16.mxu0 %v1166_v37  ;;  %v609_v17 = vld [vmem:[#allocation7 + $0x278] sm:$0xff]  ;;  %v1208_v19 = vpack.c.bf16 %v604_v15, %v602_v14  ;;  %v606_v22 = vld [vmem:[#allocation7 + $0x260] sm:$0xff]  ;;  %v612_v0 = vld [vmem:[#allocation7 + $0x290] sm:$0xff] }
  0x95   :  { %1121 = vmatpush3.bf16.msra.mxu1 %v1120_v33  ;;  %v1635_v33 = vshrl.u32 %v364_v32, 7  ;;  %v610_v27 = vld [vmem:[#allocation7 + $0x280] sm:$0xff]  ;;  %v617_v29 = vld [vmem:[#allocation7 + $0x2b8] sm:$0xff]  ;;  %v628_v58 = vld [vmem:[#allocation7 + $0x310] sm:$0xff] }
  0x96   :  { %1122 = vmatprep.subr.bf16.mxu1 %v1468_v52  ;;  %v1216_v30 = vpack.c.bf16 %v612_v0, %v610_v27  ;;  %v614_v32 = vld [vmem:[#allocation7 + $0x2a0] sm:$0xff]  ;;  %v643_v14 = vld [vmem:[#allocation7 + $0x388] sm:$0xff]  ;;  %v645_v15 = vld [vmem:[#allocation7 + $0x398] sm:$0xff] }
  0x97   :  { %1169 = vmatpush1.bf16.msra.mxu0 %v1168_v43  ;;  %v1638_v34 = vsub.s32 0, %v1635_v33  ;;  %v1653_v38 = vsub.s32 1, %v1635_v33  ;;  %v374_v43 = vsub.s32 2, %v1635_v33  ;;  %v382_v55 = vsub.s32 4, %v1635_v33  ;;  %v626_v57 = vld [vmem:[#allocation7 + $0x300] sm:$0xff]  ;;  %v653_v27 = vld [vmem:[#allocation7 + $0x3d8] sm:$0xff] }
  0x98   :  { %1171 = vmatprep.subr.bf16.mxu0 %v1170_v46 }
  0x99   :  { %1124 = vmatpush3.bf16.msra.mxu1 %v1123_v42  ;;  %v367_v37 = vrot.slane %v1643_v35, %v1638_v34  ;;  %v400_v39 = vrot.slane %v1648_v36, %v1638_v34  ;;  %v371_v44 = vrot.slane %v1643_v35, %v1653_v38  ;;  %v375_v47 = vrot.slane %v1643_v35, %v374_v43 }
  0x9a   :  { %1125 = vmatprep.subr.bf16.mxu1 %v1468_v52  ;;  %v404_v49 = vrot.slane %v1648_v36, %v1653_v38  ;;  %v408_v50 = vrot.slane %v1648_v36, %v374_v43  ;;  %v383_v1 = vrot.slane %v1643_v35, %v382_v55  ;;  %v416_v8 = vrot.slane %v1648_v36, %v382_v55  ;;  %v618_v43 = vld [vmem:[#allocation7 + $0x2c0] sm:$0xff] }
  0x9b   :  { %1173 = vmatpush1.bf16.msra.mxu0 %v1172_v53 }
  0x9c   :  { %1175 = vmatprep.subr.bf16.mxu0 %v1174_v54 }
  0x9d   :  { %1127 = vmatpush3.bf16.msra.mxu1 %v1126_v51 }
  0x9e   :  { %1128 = vmatprep.subr.bf16.mxu1 %v1468_v52 }
  0x9f   :  { %1177 = vmatpush1.bf16.msra.mxu0 %v1176_v59 }
  0xa0   :  { %1179 = vmatprep.subr.bf16.mxu0 %v1178_v60  ;;  %v599_v60 = vld [vmem:[#allocation7 + $0x228] sm:$0xff] }
  0xa1   :  { %1130 = vmatpush3.bf16.msra.mxu1 %v1129_v7  ;;  %v605_v7 = vld [vmem:[#allocation7 + $0x258] sm:$0xff] }
  0xa2   :  { %1131 = vmatprep.subr.bf16.mxu1 %v1468_v52  ;;  %v1194_v52 = vpack.c.bf16 %v593_v26, %v591_v24  ;;  %v1206_v13 = vpack.c.bf16 %v605_v7, %v603_v6  ;;  %v613_v24 = vld [vmem:[#allocation7 + $0x298] sm:$0xff]  ;;  %v1212_v26 = vpack.c.bf16 %v608_v23, %v606_v22  ;;  %v634_v6 = vld [vmem:[#allocation7 + $0x340] sm:$0xff]  ;;  %v636_v7 = vld [vmem:[#allocation7 + $0x350] sm:$0xff]  ;;  %v378_v23 = vsub.s32 3, %v1635_v33 }
  0xa3   :  { %1181 = vmatpush1.bf16.msra.mxu0 %v1180_v2 }
  0xa4   :  { %1183 = vmatprep.subr.bf16.mxu0 %v1182_v3  ;;  %v1202_v3 = vpack.c.bf16 %v601_v61, %v599_v60  ;;  %v633_v60 = vld [vmem:[#allocation7 + $0x338] sm:$0xff]  ;;  %v1232_v61 = vpack.c.bf16 %v628_v58, %v626_v57  ;;  %v851_v57 = vld [vmem:[#allocation9 + $0xa0] sm:$0xff]  ;;  %v852_v58 = vld [vmem:[#allocation9 + $0xa8] sm:$0xff] }
  0xa5   :  { %1133 = vmatpush3.bf16.msra.mxu1 %v1132_v16  ;;  %v607_v16 = vld [vmem:[#allocation7 + $0x268] sm:$0xff] }
  0xa7   :  { %1185 = vmatpush1.bf16.msra.mxu0 %v1184_v9 }
  0xa8   :  { %1187 = vmatprep.subr.bf16.mxu0 %v1186_v12 }
  0xab   :  { %1189 = vmatpush1.bf16.msra.mxu0 %v1188_v18 }
  0xac   :  { %1191 = vmatprep.subr.bf16.mxu0 %v1190_v21  ;;  %v1210_v21 = vpack.c.bf16 %v609_v17, %v607_v16  ;;  %v1246_v17 = vpack.c.bf16 %v645_v15, %v643_v14 }
  0xaf   :  { %1193 = vmatpush1.bf16.msra.mxu0 %v1192_v25  ;;  %v611_v25 = vld [vmem:[#allocation7 + $0x288] sm:$0xff] }
  0xb0   :  { %1195 = vmatprep.subr.bf16.mxu0 %v1194_v52  ;;  %v1214_v52 = vpack.c.bf16 %v613_v24, %v611_v25  ;;  %v646_v24 = vld [vmem:[#allocation7 + $0x3a0] sm:$0xff] }
  0xb3   :  { %1197 = vmatpush1.bf16.msra.mxu0 %v1196_v28  ;;  %v615_v28 = vld [vmem:[#allocation7 + $0x2a8] sm:$0xff] }
  0xb4   :  { %1199 = vmatprep.subr.bf16.mxu0 %v1198_v31  ;;  %v1218_v31 = vpack.c.bf16 %v617_v29, %v615_v28  ;;  %v379_v28 = vrot.slane %v1643_v35, %v378_v23 }
 0x14b   :  { %v216_v40 = vpop.f32.mrb[0].mxu1 }
 0x14c   :  { %v389_v41 = vmul.f32 %v367_v37, %v216_v40  ;;  %v218_v42 = vpop.f32.mrb[1].mxu1  ;;  %v616_v37 = vld [vmem:[#allocation7 + $0x2b0] sm:$0xff]  ;;  %v621_v40 = vld [vmem:[#allocation7 + $0x2d8] sm:$0xff] }
 0x14d   :  { %v390_v48 = vmul.f32 %v371_v44, %v218_v42  ;;  %v620_v44 = vld [vmem:[#allocation7 + $0x2d0] sm:$0xff] }
 0x14e   :  { %v422_v45 = vadd.f32 %v400_v39, %v389_v41  ;;  %v619_v39 = vld [vmem:[#allocation7 + $0x2c8] sm:$0xff]  ;;  %v1220_v41 = vpack.c.bf16 %v616_v37, %v614_v32  ;;  %v657_v37 = vld [vmem:[#allocation7 + $0x3f8] sm:$0xff] }
 0x14f   :  { %v423_v56 = vadd.f32 %v404_v49, %v390_v48  ;;  %v1222_v42 = vpack.c.bf16 %v621_v40, %v619_v39  ;;  %v622_v49 = vld [vmem:[#allocation7 + $0x2e0] sm:$0xff]  ;;  %v655_v32 = vld [vmem:[#allocation7 + $0x3e8] sm:$0xff]  ;;  %v412_v40 = vrot.slane %v1648_v36, %v378_v23 }
 0x150   :  { %v427_v46 = vmax.f32 %v422_v45, 0.0  ;;  %v623_v45 = vld [vmem:[#allocation7 + $0x2e8] sm:$0xff] }
 0x151   :  { %v428_v2 = vmax.f32 %v423_v56, 0.0  ;;  %v844_v23 = vld [vmem:[#allocation9 + $0x68] sm:$0xff] }
 0x152   :  { %1086 = vmatmul.mubr.f32.vlgmr.msra.gmra.mrb[6].mxu1 %v427_v46  ;;  %v625_v46 = vld [vmem:[#allocation7 + $0x2f8] sm:$0xff] }
 0x153   :  { %v287_v51 = vpop.f32.mrb[2].mxu1  ;;  %v1226_v48 = vpack.c.bf16 %v625_v46, %v623_v45  ;;  %v847_v46 = vld [vmem:[#allocation9 + $0x80] sm:$0xff] }
 0x154   :  { %v391_v53 = vmul.f32 %v375_v47, %v287_v51  ;;  %v1664_v54 = vpop.f32.mrb[3].mxu1  ;;  %v1224_v47 = vpack.c.bf16 %v620_v44, %v618_v43  ;;  %v627_v51 = vld [vmem:[#allocation7 + $0x308] sm:$0xff]  ;;  %v656_v43 = vld [vmem:[#allocation7 + $0x3f0] sm:$0xff] }
 0x155   :  { %v392_v33 = vmul.f32 %v379_v28, %v1664_v54  ;;  %v850_v54 = vld [vmem:[#allocation9 + $0x98] sm:$0xff] }
 0x156   :  { %v424_v59 = vadd.f32 %v408_v50, %v391_v53  ;;  %v624_v50 = vld [vmem:[#allocation7 + $0x2f0] sm:$0xff]  ;;  %v629_v53 = vld [vmem:[#allocation7 + $0x318] sm:$0xff] }
 0x157   :  { %v1228_v55 = vpack.c.bf16 %v624_v50, %v622_v49  ;;  %v1230_v56 = vpack.c.bf16 %v629_v53, %v627_v51  ;;  %v425_v45 = vadd.f32 %v412_v40, %v392_v33  ;;  %v832_v50 = vld [vmem:[#allocation9 + $0x8] sm:$0xff]  ;;  %v849_v51 = vld [vmem:[#allocation9 + $0x90] sm:$0xff] }
 0x158   :  { %v429_v62 = vmax.f32 %v424_v59, 0.0  ;;  %v631_v59 = vld [vmem:[#allocation7 + $0x328] sm:$0xff]  ;;  %v1266_v36 = vpack.c.bf16 %v850_v54, %v849_v51 }
 0x159   :  { %v430_v35 = vmax.f32 %v425_v45, 0.0 }
 0x15a   :  { %722 = vmatprep.mubr.f32.mxu0 %v429_v62  ;;  %v1234_v62 = vpack.c.bf16 %v633_v60, %v631_v59  ;;  %v1270_v60 = vpack.c.bf16 %v852_v58, %v851_v57 }
 0x15b   :  { %723 = vmatmul.mubr.f32.vlgmr.msra.gmra.mrb[0].mxu0 %v428_v2  ;;  %v358_v9 = vpop.f32.mrb[4].mxu1  ;;  %v635_v2 = vld [vmem:[#allocation7 + $0x348] sm:$0xff] }
 0x15c   :  { %1201 = vmatpush1.bf16.msra.mxu0 %v1200_v63  ;;  %v393_v11 = vmul.f32 %v383_v1, %v358_v9  ;;  %v1052_v12 = vpop.f32.mrb[5].mxu1  ;;  %v630_v63 = vld [vmem:[#allocation7 + $0x320] sm:$0xff]  ;;  %v632_v1 = vld [vmem:[#allocation7 + $0x330] sm:$0xff]  ;;  %v641_v9 = vld [vmem:[#allocation7 + $0x378] sm:$0xff] }
 0x15d   :  { %1203 = vmatprep.subr.bf16.mxu0 %v1202_v3  ;;  %v637_v3 = vld [vmem:[#allocation7 + $0x358] sm:$0xff]  ;;  %v1236_v4 = vpack.c.bf16 %v632_v1, %v630_v63  ;;  %v638_v12 = vld [vmem:[#allocation7 + $0x360] sm:$0xff]  ;;  %v853_v63 = vld [vmem:[#allocation9 + $0xb0] sm:$0xff] }
 0x15e   :  { %v426_v18 = vadd.f32 %v416_v8, %v393_v11  ;;  %v1238_v5 = vpack.c.bf16 %v637_v3, %v635_v2  ;;  %v639_v8 = vld [vmem:[#allocation7 + $0x368] sm:$0xff]  ;;  %v854_v1 = vld [vmem:[#allocation9 + $0xb8] sm:$0xff] }
 0x15f   :  { %v1242_v11 = vpack.c.bf16 %v641_v9, %v639_v8  ;;  %v1274_v3 = vpack.c.bf16 %v854_v1, %v853_v63 }
 0x160   :  { %1205 = vmatpush1.bf16.msra.mxu0 %v1204_v10  ;;  %v431_v20 = vmax.f32 %v426_v18, 0.0  ;;  %v1240_v10 = vpack.c.bf16 %v636_v7, %v634_v6  ;;  %v642_v18 = vld [vmem:[#allocation7 + $0x380] sm:$0xff]  ;;  %v856_v7 = vld [vmem:[#allocation9 + $0xc8] sm:$0xff] }
 0x161   :  { %1207 = vmatprep.subr.bf16.mxu0 %v1206_v13  ;;  %v640_v13 = vld [vmem:[#allocation7 + $0x370] sm:$0xff]  ;;  %v855_v6 = vld [vmem:[#allocation9 + $0xc0] sm:$0xff] }
 0x162   :  { %793 = vmatprep.mubr.f32.mxu0 %v431_v20  ;;  %v1244_v16 = vpack.c.bf16 %v640_v13, %v638_v12  ;;  %v647_v20 = vld [vmem:[#allocation7 + $0x3a8] sm:$0xff]  ;;  %v1278_v9 = vpack.c.bf16 %v856_v7, %v855_v6  ;;  %v857_v12 = vld [vmem:[#allocation9 + $0xd0] sm:$0xff]  ;;  %v858_v13 = vld [vmem:[#allocation9 + $0xd8] sm:$0xff] }
 0x163   :  { %v1282_v15 = vpack.c.bf16 %v858_v13, %v857_v12 }
 0x164   :  { %1209 = vmatpush1.bf16.msra.mxu0 %v1208_v19  ;;  %v644_v19 = vld [vmem:[#allocation7 + $0x390] sm:$0xff] }
 0x165   :  { %1211 = vmatprep.subr.bf16.mxu0 %v1210_v21  ;;  %v649_v21 = vld [vmem:[#allocation7 + $0x3b8] sm:$0xff]  ;;  %v1248_v22 = vpack.c.bf16 %v644_v19, %v642_v18  ;;  %v859_v19 = vld [vmem:[#allocation9 + $0xe0] sm:$0xff] }
 0x166   :  { %v1250_v25 = vpack.c.bf16 %v649_v21, %v647_v20  ;;  %v860_v20 = vld [vmem:[#allocation9 + $0xe8] sm:$0xff] }
 0x167   :  { %v1286_v21 = vpack.c.bf16 %v860_v20, %v859_v19 }
 0x168   :  { %1213 = vmatpush1.bf16.msra.mxu0 %v1212_v26  ;;  %v648_v26 = vld [vmem:[#allocation7 + $0x3b0] sm:$0xff] }
 0x169   :  { %1215 = vmatprep.subr.bf16.mxu0 %v1214_v52  ;;  %v651_v52 = vld [vmem:[#allocation7 + $0x3c8] sm:$0xff]  ;;  %v1252_v0 = vpack.c.bf16 %v648_v26, %v646_v24  ;;  %v861_v24 = vld [vmem:[#allocation9 + $0xf0] sm:$0xff]  ;;  %v862_v26 = vld [vmem:[#allocation9 + $0xf8] sm:$0xff] }
 0x16a   :  { %v1254_v29 = vpack.c.bf16 %v653_v27, %v651_v52  ;;  %v1290_v52 = vpack.c.bf16 %v862_v26, %v861_v24  ;;  %v845_v27 = vld [vmem:[#allocation9 + $0x70] sm:$0xff] }
 0x16c   :  { %1217 = vmatpush1.bf16.msra.mxu0 %v1216_v30  ;;  %v650_v30 = vld [vmem:[#allocation7 + $0x3c0] sm:$0xff] }
 0x16d   :  { %1219 = vmatprep.subr.bf16.mxu0 %v1218_v31  ;;  %v652_v31 = vld [vmem:[#allocation7 + $0x3d0] sm:$0xff] }
 0x16e   :  { %v1256_v39 = vpack.c.bf16 %v652_v31, %v650_v30 }
 0x170   :  { %1221 = vmatpush1.bf16.msra.mxu0 %v1220_v41  ;;  %v1258_v41 = vpack.c.bf16 %v657_v37, %v655_v32  ;;  %v800_v37 = vld [vmem:[%s1706_s5] ss:$2 sm:$0x3] }
 0x171   :  { %1223 = vmatprep.subr.bf16.mxu0 %v1222_v42  ;;  %v654_v42 = vld [vmem:[#allocation7 + $0x3e0] sm:$0xff]  ;;  %v805_v33 = vrot.slane %v800_v37, %v1638_v34  ;;  %v809_v40 = vrot.slane %v800_v37, %v1653_v38 }
 0x172   :  { %v1260_v44 = vpack.c.bf16 %v656_v43, %v654_v42 }
 0x174   :  { %1225 = vmatpush1.bf16.msra.mxu0 %v1224_v47  ;;  %v848_v47 = vld [vmem:[#allocation9 + $0x88] sm:$0xff] }
 0x175   :  { %1227 = vmatprep.subr.bf16.mxu0 %v1226_v48  ;;  %v831_v48 = vld [vmem:[#allocation9] sm:$0xff]  ;;  %v1262_v49 = vpack.c.bf16 %v848_v47, %v847_v46 }
 0x176   :  { %v1264_v53 = vpack.c.bf16 %v832_v50, %v831_v48 }
 0x177   :  { %1263 = vmatprep.subr.bf16.mxu1 %v1262_v49 }
 0x178   :  { %1229 = vmatpush1.bf16.msra.mxu0 %v1228_v55  ;;  %v833_v55 = vld [vmem:[#allocation9 + $0x10] sm:$0xff]  ;;  %1265 = vmatpush3.bf16.msra.mxu1 %v1264_v53 }
 0x179   :  { %1231 = vmatprep.subr.bf16.mxu0 %v1230_v56  ;;  %v834_v56 = vld [vmem:[#allocation9 + $0x18] sm:$0xff]  ;;  %1267 = vmatprep.subr.bf16.mxu1 %v1266_v36 }
 0x17a   :  { %v1268_v59 = vpack.c.bf16 %v834_v56, %v833_v55  ;;  %v982_v56 = vld [vmem:[%s1708_s7 + $0x1] ss:$0 sm:$0xff] }
 0x17c   :  { %1233 = vmatpush1.bf16.msra.mxu0 %v1232_v61  ;;  %v835_v61 = vld [vmem:[#allocation9 + $0x20] sm:$0xff]  ;;  %1269 = vmatpush3.bf16.msra.mxu1 %v1268_v59 }
 0x17d   :  { %1235 = vmatprep.subr.bf16.mxu0 %v1234_v62  ;;  %v836_v62 = vld [vmem:[#allocation9 + $0x28] sm:$0xff]  ;;  %1271 = vmatprep.subr.bf16.mxu1 %v1270_v60  ;;  %v983_v60 = vld [vmem:[%s1710_s9 + $0x1] ss:$0 sm:$0xff] }
 0x17e   :  { %v1272_v2 = vpack.c.bf16 %v836_v62, %v835_v61 }
 0x180   :  { %1237 = vmatpush1.bf16.msra.mxu0 %v1236_v4  ;;  %v837_v4 = vld [vmem:[#allocation9 + $0x30] sm:$0xff]  ;;  %1273 = vmatpush3.bf16.msra.mxu1 %v1272_v2  ;;  %v984_v2 = vld [vmem:[%s1710_s9 + $0x2] ss:$0 sm:$0xff] }
 0x181   :  { %1239 = vmatprep.subr.bf16.mxu0 %v1238_v5  ;;  %v838_v5 = vld [vmem:[#allocation9 + $0x38] sm:$0xff]  ;;  %1275 = vmatprep.subr.bf16.mxu1 %v1274_v3 }
 0x182   :  { %v1276_v8 = vpack.c.bf16 %v838_v5, %v837_v4 }
 0x184   :  { %1241 = vmatpush1.bf16.msra.mxu0 %v1240_v10  ;;  %v839_v10 = vld [vmem:[#allocation9 + $0x40] sm:$0xff]  ;;  %1277 = vmatpush3.bf16.msra.mxu1 %v1276_v8 }
 0x185   :  { %1243 = vmatprep.subr.bf16.mxu0 %v1242_v11  ;;  %v840_v11 = vld [vmem:[#allocation9 + $0x48] sm:$0xff]  ;;  %1279 = vmatprep.subr.bf16.mxu1 %v1278_v9 }
 0x186   :  { %v1280_v14 = vpack.c.bf16 %v840_v11, %v839_v10 }
 0x188   :  { %1245 = vmatpush1.bf16.msra.mxu0 %v1244_v16  ;;  %v841_v16 = vld [vmem:[#allocation9 + $0x50] sm:$0xff]  ;;  %1281 = vmatpush3.bf16.msra.mxu1 %v1280_v14 }
 0x189   :  { %1247 = vmatprep.subr.bf16.mxu0 %v1246_v17  ;;  %v842_v17 = vld [vmem:[#allocation9 + $0x58] sm:$0xff]  ;;  %1283 = vmatprep.subr.bf16.mxu1 %v1282_v15 }
 0x18a   :  { %v1284_v18 = vpack.c.bf16 %v842_v17, %v841_v16 }
 0x18c   :  { %1249 = vmatpush1.bf16.msra.mxu0 %v1248_v22  ;;  %1285 = vmatpush3.bf16.msra.mxu1 %v1284_v18  ;;  %v843_v22 = vld [vmem:[#allocation9 + $0x60] sm:$0xff] }
 0x18d   :  { %1251 = vmatprep.subr.bf16.mxu0 %v1250_v25  ;;  %v1288_v25 = vpack.c.bf16 %v844_v23, %v843_v22  ;;  %1287 = vmatprep.subr.bf16.mxu1 %v1286_v21 }
 0x190   :  { %1253 = vmatpush1.bf16.msra.mxu0 %v1252_v0  ;;  %1289 = vmatpush3.bf16.msra.mxu1 %v1288_v25  ;;  %v846_v0 = vld [vmem:[#allocation9 + $0x78] sm:$0xff] }
 0x191   :  { %1255 = vmatprep.subr.bf16.mxu0 %v1254_v29  ;;  %v1292_v28 = vpack.c.bf16 %v846_v0, %v845_v27  ;;  %1291 = vmatprep.subr.bf16.mxu1 %v1290_v52  ;;  %v979_v29 = vld [vmem:[%s1710_s9] ss:$0 sm:$0xff] }
 0x194   :  { %1257 = vmatpush1.bf16.msra.mxu0 %v1256_v39  ;;  %1293 = vmatpush3.bf16.msra.mxu1 %v1292_v28  ;;  %v980_v39 = vld [vmem:[%s1706_s5 + $0x1] ss:$2 sm:$0x3] }
 0x195   :  { %1259 = vmatprep.subr.bf16.mxu0 %v1258_v41  ;;  %v820_v41 = vrot.slane %v980_v39, %v1638_v34  ;;  %v824_v43 = vrot.slane %v980_v39, %v1653_v38  ;;  %v981_v38 = vld [vmem:[%s1708_s7] ss:$0 sm:$0xff] }
 0x198   :  { %1261 = vmatpush1.bf16.msra.mxu0 %v1260_v44 }
 0x19b   :  { %794 = vmatmul.mubr.f32.vlgmr.msra.gmra.mrb[0].mxu0 %v430_v35 }
 0x225   :  { %v519_v30 = vpop.f32.mrb[6].mxu1 }
 0x226   :  { %v520_v31 = vadd.f32 %v979_v29, %v519_v30  ;;  %v1087_v32 = vpop.f32.mrb[7].mxu1 }
 0x228   :  { %523 = vmax.xlane.f32.xlu0 %v520_v31 }
 0x26e   :  { %v795_v42 = vpop.f32.mrb[0].mxu0 }
 0x26f   :  { %v812_v44 = vmul.f32 %v805_v33, %v795_v42  ;;  %v797_v45 = vpop.f32.mrb[1].mxu0 }
 0x270   :  { %v813_v35 = vmul.f32 %v809_v40, %v797_v45 }
 0x271   :  { %v827_v46 = vadd.f32 %v820_v41, %v812_v44 }
 0x272   :  { %v828_v47 = vadd.f32 %v824_v43, %v813_v35 }
 0x273   :  { %v829_v49 = vmax.f32 %v827_v46, 0.0 }
 0x274   :  { %v830_v48 = vmax.f32 %v828_v47, 0.0 }
 0x276   :  { %927 = vmatprep.mubr.f32.mxu1 %v830_v48 }
 0x277   :  { %928 = vmatmul.mubr.f32.vlgmr.msra.gmra.mrb[8].mxu1 %v829_v49 }
 0x2b5   :  { %v524_v50 = vpop.xlane.xlu0 %523 }
 0x2b6   :  { %v525_v51 = vsub.f32 %v520_v31, %v524_v50 }
 0x2b8   :  { %v526_v54 = vmul.f32 1.442695, %v525_v51 }
 0x2ba   :  { %1311 = vpow2.f32 %v526_v54 }
 0x2c4   :  { %v1312_v53 = vpop.eup %1311 }
 0x2c5   :  { %528 = vadd.xlane.f32.xlu0 %v1312_v53 }
 0x34a   :  { %v1039_v36 = vpop.f32.mrb[8].mxu1 }
 0x34b   :  { %v1040_v34 = vpop.f32.mrb[9].mxu1 }
 0x34c   :  { %v1041_v55 = vadd.f32 %v1040_v34, %v1039_v36 }
 0x34e   :  { %v938_v57 = vmul.f32 %v1041_v55, %v981_v38 }
 0x350   :  { %v944_v58 = vadd.f32 %v982_v56, %v938_v57 }
 0x352   :  { %v945_v59 = vmax.f32 %v944_v58, 0.0  ;;  %v529_v63 = vpop.xlane.xlu0 %528 }
 0x353   :  { %1313 = vrcp.f32 %v529_v63 }
 0x354   :  { %v946_v61 = vmul.f32 %v1312_v53, %v945_v59 }
 0x356   :  { %v952_v62 = vmul.f32 %v983_v60, %v946_v61 }
 0x358   :  { %953 = vadd.xlane.f32.xlu1 %v952_v62 }
 0x35d   :  { %v1314_v1 = vpop.eup %1313 }
 0x3e5   :  { %v954_v3 = vpop.xlane.xlu1 %953 }
 0x3e6   :  { %v956_v4 = vmul.f32 %v1314_v1, %v954_v3 }
 0x3e8   :  { %v962_v5 = vadd.f32 %v984_v2, %v956_v4 }
 0x3ea   :  { %964 = vst.msk [vmem:[%s1711_s10] sm:$0xff] %vm963_vm2, %v962_v5 }
 0x3eb   :  { %969 = vsyncpa [#allocation3], 1 }
 0x3ec   :  { %970 = vsyncpa [#allocation5], 1 }
 0x3ed   :  { %971 = vsyncpa [#allocation8], 1 }
 0x3ee   :  { %972 = vsyncpa [#allocation11], 1 }

</bundles_post_ra>
